<compile_context>
chip_gen: v7x
topology: tpu7x:2x2x1
jax: 0.10.0
libtpu: 0.0.40
codegen_flags: <defaults>
</compile_context>

<pallas_src>
import functools

import jax
import jax.numpy as jnp
from jax.experimental import pallas as pl
from jax.experimental.pallas import tpu as pltpu


def _striped_copy_kernel(emb_hbm_ref, out_hbm_ref, sem, *, chunks):
    """Copy emb_weight[:seq, :] -> out via `len(chunks)` row-striped HBM->HBM DMAs.

    `chunks` is a static tuple of (row_start, row_count).  All DMAs are started
    first, then all are waited, so the descriptors are outstanding concurrently.
    """
    copies = []
    for idx, (start, size) in enumerate(chunks):
        cp = pltpu.make_async_copy(
            emb_hbm_ref.at[pl.ds(start, size), :],
            out_hbm_ref.at[pl.ds(start, size), :],
            sem.at[idx],
        )
        cp.start()
        copies.append(cp)
    for cp in copies:
        cp.wait()


def _plan_chunks(seq, model_dim, itemsize, stripes=None):
    """Static (row_start, row_count) plan with sublane-tile-aligned boundaries."""
    # Sublane tile height: 8 rows of f32, 16 of bf16, 32 of int8.
    sublane = 8 * max(1, 4 // max(1, itemsize))
    total_bytes = seq * model_dim * itemsize

    if stripes is None:
        if total_bytes < (2 << 20):          # < 2 MiB: one DMA is already optimal
            stripes = 1
        else:
            # ~1 MiB per stripe, capped at 8 outstanding descriptors.
            stripes = min(8, max(1, total_bytes // (1 << 20)))
    # Never more stripes than whole sublane-tile row groups.
    stripes = int(min(stripes, max(1, seq // sublane)))

    rows_per = -(-seq // stripes)                      # ceil
    rows_per = -(-rows_per // sublane) * sublane       # round up to sublane tile
    chunks = []
    start = 0
    while start < seq:
        size = min(rows_per, seq - start)
        chunks.append((start, size))
        start += size
    return tuple(chunks)


def learned_position_embeddings_fwd(x, emb_weight, *, stripes=None):
    """Returns emb_weight[0:x.shape[1], :] (== PyTorch forward(x)).

    x:          (batch, seq) — only the static shape[1] is used.
    emb_weight: (seq_len, model_dim) embedding table.
    stripes:    optional override for the number of parallel DMA stripes.
    """
    seq = x.shape[1]
    seq_len, model_dim = emb_weight.shape
    assert seq <= seq_len, "requested positions exceed embedding table size"

    if seq == 0:
        return jnp.zeros((0, model_dim), dtype=emb_weight.dtype)
    if seq == seq_len:
        # Full-table lookup: nothing to copy.
        return emb_weight

    chunks = _plan_chunks(seq, model_dim, emb_weight.dtype.itemsize, stripes)
    kernel = functools.partial(_striped_copy_kernel, chunks=chunks)

    return pl.pallas_call(
        kernel,
        out_shape=jax.ShapeDtypeStruct((seq, model_dim), emb_weight.dtype),
        # Both operands stay in HBM; the kernel drives the DMAs itself.
        in_specs=[pl.BlockSpec(memory_space=pl.ANY)],
        out_specs=pl.BlockSpec(memory_space=pl.ANY),
        scratch_shapes=[pltpu.SemaphoreType.DMA((len(chunks),))],
    )(emb_weight)


# TODO(synk): get_fixed_embedding(ind, dev) (a 1-row lookup) is a separate
# method, not part of forward(); it is not implemented here.


if __name__ == "__main__":
    key = jax.random.PRNGKey(0)
    k_w, k_x, k_w2 = jax.random.split(key, 3)

    # ---- Test 1: small shapes matching the module (single-DMA path) ----
    SEQ_LEN, MODEL_DIM, BATCH, SEQ = 16, 32, 2, 8
    emb_weight = 0.02 * jax.random.normal(k_w, (SEQ_LEN, MODEL_DIM), dtype=jnp.float32)
    x = jax.random.randint(k_x, (BATCH, SEQ), 0, SEQ_LEN, dtype=jnp.int32)

    out = jax.block_until_ready(learned_position_embeddings_fwd(x, emb_weight))
    ref = emb_weight[:SEQ, :]
    assert out.shape == (SEQ, MODEL_DIM) and out.dtype == emb_weight.dtype
    assert jnp.allclose(out, ref), "mismatch vs reference embedding slice"

    # ---- Test 2: exercise the multi-stripe DMA path (forced stripes=4) ----
    SEQ_LEN2, MODEL_DIM2, SEQ2 = 64, 128, 48
    emb_weight2 = 0.02 * jax.random.normal(
        k_w2, (SEQ_LEN2, MODEL_DIM2), dtype=jnp.float32
    )
    x2 = jnp.zeros((BATCH, SEQ2), dtype=jnp.int32)
    out2 = jax.block_until_ready(
        learned_position_embeddings_fwd(x2, emb_weight2, stripes=4)
    )
    assert jnp.allclose(out2, emb_weight2[:SEQ2, :]), "striped copy mismatch"

    # ---- Test 3: full-table fast path (zero-copy) ----
    x3 = jnp.zeros((BATCH, SEQ_LEN), dtype=jnp.int32)
    out3 = jax.block_until_ready(learned_position_embeddings_fwd(x3, emb_weight))
    assert jnp.allclose(out3, emb_weight), "full-table fast path mismatch"

    print("KERNEL_OK")
</pallas_src>

<mosaic_0001>
module attributes {stable_mosaic.version = 11 : i64} {
  func.func @_striped_copy_kernel(%arg0: memref<16x32xf32, #tpu.memory_space<any>>, %arg1: memref<8x32xf32, #tpu.memory_space<any>>, %arg2: memref<1x!tpu.dma_semaphore, #tpu.memory_space<semaphore_mem>>) attributes {dimension_semantics = [], scalar_prefetch = 0 : i64, scratch_operands = 1 : i64, tpu.core_type = #tpu.core_type<tc>} {
    %c0_i32 = arith.constant 0 : i32
    %c0_i32_0 = arith.constant 0 : i32
    %c0_i32_1 = arith.constant 0 : i32
    %0 = tpu.memref_slice %arg0[%c0_i32_0, %c0_i32_1] : memref<16x32xf32, #tpu.memory_space<any>> -> memref<8x32xf32, #tpu.memory_space<any>>
    %c0_i32_2 = arith.constant 0 : i32
    %c0_i32_3 = arith.constant 0 : i32
    %1 = tpu.memref_slice %arg1[%c0_i32_2, %c0_i32_3] : memref<8x32xf32, #tpu.memory_space<any>> -> memref<8x32xf32, #tpu.memory_space<any>>
    %2 = tpu.memref_slice %arg2[%c0_i32] : memref<1x!tpu.dma_semaphore, #tpu.memory_space<semaphore_mem>> -> memref<1x!tpu.dma_semaphore, #tpu.memory_space<semaphore_mem>>
    %3 = tpu.memref_squeeze %2 : memref<1x!tpu.dma_semaphore, #tpu.memory_space<semaphore_mem>> -> memref<!tpu.dma_semaphore, #tpu.memory_space<semaphore_mem>>
    tpu.enqueue_dma source(%0 : memref<8x32xf32, #tpu.memory_space<any>>) target(%1 : memref<8x32xf32, #tpu.memory_space<any>>) target_semaphore(%3 : memref<!tpu.dma_semaphore, #tpu.memory_space<semaphore_mem>>)
    %c0_i32_4 = arith.constant 0 : i32
    %c0_i32_5 = arith.constant 0 : i32
    %c0_i32_6 = arith.constant 0 : i32
    %4 = tpu.memref_slice %arg0[%c0_i32_5, %c0_i32_6] : memref<16x32xf32, #tpu.memory_space<any>> -> memref<8x32xf32, #tpu.memory_space<any>>
    %c0_i32_7 = arith.constant 0 : i32
    %c0_i32_8 = arith.constant 0 : i32
    %5 = tpu.memref_slice %arg1[%c0_i32_7, %c0_i32_8] : memref<8x32xf32, #tpu.memory_space<any>> -> memref<8x32xf32, #tpu.memory_space<any>>
    %6 = tpu.memref_slice %arg2[%c0_i32_4] : memref<1x!tpu.dma_semaphore, #tpu.memory_space<semaphore_mem>> -> memref<1x!tpu.dma_semaphore, #tpu.memory_space<semaphore_mem>>
    %7 = tpu.memref_squeeze %6 : memref<1x!tpu.dma_semaphore, #tpu.memory_space<semaphore_mem>> -> memref<!tpu.dma_semaphore, #tpu.memory_space<semaphore_mem>>
    tpu.wait_dma2 semaphore(%7 : memref<!tpu.dma_semaphore, #tpu.memory_space<semaphore_mem>>) src(%4 : memref<8x32xf32, #tpu.memory_space<any>>) dst(%5 : memref<8x32xf32, #tpu.memory_space<any>>)
    return
  }
}

</mosaic_0001>

<bundles_post_ra>
// kernel: tpu_custom_call.1
= control target key start
LH: loop header
LB: loop body
LE: loop exit
PB: predicated region body
PF: predicated region fallthrough
CT: control target
= control target key end

     0   :  { %s34_s6 = smov [#allocation2]   ;;  %s35_s7 = smov [#allocation3]   ;;  %s53_s0 = inlined_call_operand.hbm [shape: f32[16,32], index: 0, kind: input, shape index: {}]   ;;  %s54_s1 = inlined_call_operand.hbm [shape: f32[8,32], index: 1, kind: output, shape index: {}]  }
   0x1   :  { %s36_s8 = smov 0  }
   0x2   :  { %18 = dma.general %s53_s0, 128, %s54_s1, %s34_s6, %s35_s7, [#allocation4], %s36_s8, 0  }
   0x3   :  { %32 = dma.done.wait [#allocation2], 128 }
   0x4   :  { %33 = vsyncadd [#allocation2], 4294967168 }
   0x5   :  { %22 = vsyncmov [#allocation2] }
   0x8   :  { %s23_s13 = vpop.sfrf %22 }
   0x9   :  { %p28_p0 = scmp.ne.s32.totalorder %s23_s13, 0 }
   0xb   :  { %27 = shalt.err (%p28_p0)  }

</bundles_post_ra>
